<compile_context>
chip_gen: v6e
topology: v6e:2x2x1
jax: 0.10.0
libtpu: 0.0.40
codegen_flags: <defaults>
</compile_context>

<pallas_src>
import functools

import jax
import jax.numpy as jnp
from jax import lax
from jax.experimental import pallas as pl
from jax.experimental.pallas import tpu as pltpu

_F32_BYTES = 4


def _ce_kernel(preds_ref, tgt_ref, out_ref, m_sc, l_sc, t_sc, *,
               tile_n, tile_c, n_total, c_total, num_c_tiles):
    """One (row-tile, class-chunk) step of online-logsumexp cross entropy."""
    i = pl.program_id(0)
    j = pl.program_id(1)

    @pl.when(j == 0)
    def _init():
        m_sc[...] = jnp.full_like(m_sc, -jnp.inf)
        l_sc[...] = jnp.zeros_like(l_sc)
        t_sc[...] = jnp.zeros_like(t_sc)

    x = preds_ref[...]                                   # (tile_n, tile_c) native dtype
    t = tgt_ref[...]                                     # (tile_n, 1) int32

    col = j * tile_c + lax.broadcasted_iota(jnp.int32, x.shape, 1)

    # Mask columns past C only when the last class chunk is ragged (static).
    if tile_c * num_c_tiles != c_total:
        neg_inf = jnp.asarray(-jnp.inf, dtype=x.dtype)
        x = jnp.where(col < c_total, x, neg_inf)

    # Target-logit gather, fused with this chunk (exact in the input dtype:
    # at most one hit per row, the rest are zeros).
    hit = col == t
    t_chunk = jnp.sum(jnp.where(hit, x, jnp.zeros_like(x)),
                      axis=-1, keepdims=True).astype(jnp.float32)
    t_sc[...] += t_chunk

    # Online logsumexp update.  Max/compare stay in the input dtype; only the
    # (tile_n, 1) results and the exp path are f32.  `x - m_new` fuses into
    # the exp per-vreg, so no full-size shifted tile is materialized.
    m_chunk = jnp.max(x, axis=-1, keepdims=True).astype(jnp.float32)
    m_prev = m_sc[...]
    m_new = jnp.maximum(m_prev, m_chunk)
    p_sum = jnp.sum(jnp.exp(x.astype(jnp.float32) - m_new),
                    axis=-1, keepdims=True)
    alpha = jnp.exp(m_prev - m_new)
    l_sc[...] = alpha * l_sc[...] + p_sum
    m_sc[...] = m_new

    @pl.when(j == num_c_tiles - 1)
    def _finalize():
        per_example = jnp.log(l_sc[...]) + m_sc[...] - t_sc[...]   # (tile_n, 1)
        # Mask rows of the (possibly partial) last row-tile past global N.
        # NOTE: keep this mask BEFORE the scalar reduction — tail rows hold
        # garbage VMEM and may be NaN/Inf; the select drops them safely.
        row = i * tile_n + lax.broadcasted_iota(jnp.int32, (tile_n, 1), 0)
        per_example = jnp.where(row < n_total, per_example, 0.0)
        partial = jnp.sum(per_example)
        # Lane-dense output block: scalar in lane 0, zeros elsewhere.
        lane = lax.broadcasted_iota(jnp.int32, (1, 128), 1)
        out_ref[...] = jnp.where(lane == 0, partial, 0.0)


def _vmem_params():
    """Per-generation VMEM scoped limit and in-kernel working-set budget."""
    cap = None
    try:
        info = pltpu.get_tpu_info()
        cap = getattr(info, "vmem_capacity_bytes", None)
    except Exception:
        cap = None
    if not cap:
        cap = 64 * 1024 * 1024          # conservative fallback: v7x per-TC VMEM
    limit = min(cap // 2, 64 * 1024 * 1024)   # 32 MiB on v7x, 64 MiB on v5e/v6e
    budget = int(limit * 0.7)                 # headroom for compiler scratch
    return limit, budget


def _rows_for(tile_c, itemsize, budget):
    """Sublane-aligned row count whose REAL residency fits the budget.

    Residency per logits row at peak: 2x double-buffered native-dtype input
    chunk + ~3 full-width f32 temporaries (exp tile, iota/compare, select).
    """
    per_row = 2 * tile_c * itemsize + 3 * tile_c * _F32_BYTES
    return max(8, (budget // per_row) // 8 * 8)


def _pick_tile_c(c, itemsize, budget, min_rows=256):
    if c <= 128 or _rows_for(c, itemsize, budget) >= min_rows:
        return c
    # Class-axis chunking (flash-style online logsumexp) so tile_n stays large.
    per_row_budget = budget // min_rows
    tc = per_row_budget // (2 * itemsize + 3 * _F32_BYTES)
    tc = max(128, (tc // 128) * 128)
    return min(tc, c)


def _pick_tile_n(n, tile_c, itemsize, budget):
    rows = _rows_for(tile_c, itemsize, budget)
    if rows >= n:
        # Everything fits in one tile; still split in two when possible so a
        # 2-TC chip (v7x) gets work on both cores and the pipeline overlaps.
        half = ((-(-n // 2)) + 7) // 8 * 8
        if half < n:
            return half
        return n
    return rows


def cross_entropy_loss(preds, targets, tile_n=None, tile_c=None):
    """preds: (N, C) float logits; targets: (N,) integer class indices."""
    n, c = preds.shape
    itemsize = jnp.dtype(preds.dtype).itemsize
    limit, budget = _vmem_params()

    if tile_c is None:
        tile_c = _pick_tile_c(c, itemsize, budget)
    else:
        tile_c = min(tile_c, c)
        if tile_c != c:
            tile_c = max(128, (tile_c // 128) * 128)

    if tile_n is None:
        tile_n = _pick_tile_n(n, tile_c, itemsize, budget)
    else:
        tile_n = min(tile_n, n)
        if tile_n != n:
            tile_n = max(8, (tile_n // 8) * 8)

    num_n_tiles = pl.cdiv(n, tile_n)
    num_c_tiles = pl.cdiv(c, tile_c)

    tgt_2d = targets.astype(jnp.int32).reshape(n, 1)

    kernel = functools.partial(
        _ce_kernel, tile_n=tile_n, tile_c=tile_c,
        n_total=n, c_total=c, num_c_tiles=num_c_tiles)

    partials = pl.pallas_call(
        kernel,
        out_shape=jax.ShapeDtypeStruct((1, num_n_tiles * 128), jnp.float32),
        grid=(num_n_tiles, num_c_tiles),
        in_specs=[
            pl.BlockSpec((tile_n, tile_c), lambda i, j: (i, j)),
            pl.BlockSpec((tile_n, 1), lambda i, j: (i, 0)),
        ],
        out_specs=pl.BlockSpec((1, 128), lambda i, j: (0, i)),
        scratch_shapes=[
            pltpu.VMEM((tile_n, 1), jnp.float32),   # running max m
            pltpu.VMEM((tile_n, 1), jnp.float32),   # running sumexp l
            pltpu.VMEM((tile_n, 1), jnp.float32),   # target-logit accumulator
        ],
        compiler_params=pltpu.CompilerParams(
            dimension_semantics=("parallel", "arbitrary"),
            vmem_limit_bytes=limit,
        ),
        cost_estimate=pl.CostEstimate(
            flops=5 * n * c,
            transcendentals=n * c,
            bytes_accessed=n * c * itemsize + n * 4 + num_n_tiles * 128 * 4,
        ),
    )(preds, tgt_2d)

    # Final mean over the *global* batch size.
    return jnp.sum(partials) / jnp.float32(n)


def _ref_ce(preds, targets):
    logp = jax.nn.log_softmax(preds.astype(jnp.float32), axis=-1)
    n = preds.shape[0]
    return -jnp.mean(logp[jnp.arange(n), targets])


if __name__ == "__main__":
    key = jax.random.PRNGKey(0)
    k1, k2, k3, k4, k5, k6 = jax.random.split(key, 6)

    # 1) Small shapes; N deliberately not a multiple of 8/16 (ragged row tail).
    N, C = 40, 32
    preds = jax.random.normal(k1, (N, C), dtype=jnp.float32)
    targets = jax.random.randint(k2, (N,), 0, C, dtype=jnp.int32)
    ref = _ref_ce(preds, targets)

    loss = cross_entropy_loss(preds, targets)
    jax.block_until_ready(loss)
    assert jnp.allclose(loss, ref, rtol=1e-5, atol=1e-5), (loss, ref)

    # 2) Forced small row tile: multi-tile batch grid + partial-tile row mask.
    loss_tiled = cross_entropy_loss(preds, targets, tile_n=16)
    jax.block_until_ready(loss_tiled)
    assert jnp.allclose(loss_tiled, ref, rtol=1e-5, atol=1e-5), (loss_tiled, ref)

    # 3) bf16 logits + forced class chunking: native-dtype streaming and the
    #    flash-style online-logsumexp reduction path (2 class chunks).
    N2, C2 = 24, 256
    preds_bf = jax.random.normal(k3, (N2, C2), dtype=jnp.bfloat16)
    targets2 = jax.random.randint(k4, (N2,), 0, C2, dtype=jnp.int32)
    ref2 = _ref_ce(preds_bf, targets2)
    loss2 = cross_entropy_loss(preds_bf, targets2, tile_c=128)
    jax.block_until_ready(loss2)
    assert jnp.allclose(loss2, ref2, rtol=1e-4, atol=1e-4), (loss2, ref2)

    # 4) Ragged class axis: C not a multiple of the class chunk (column mask).
    N3, C3 = 40, 200
    preds3 = jax.random.normal(k5, (N3, C3), dtype=jnp.float32)
    targets3 = jax.random.randint(k6, (N3,), 0, C3, dtype=jnp.int32)
    ref3 = _ref_ce(preds3, targets3)
    loss3 = cross_entropy_loss(preds3, targets3, tile_n=16, tile_c=128)
    jax.block_until_ready(loss3)
    assert jnp.allclose(loss3, ref3, rtol=1e-5, atol=1e-5), (loss3, ref3)

    print("KERNEL_OK")
</pallas_src>

<mosaic_0001>
module attributes {stable_mosaic.version = 11 : i64} {
  func.func @_ce_kernel(%arg0: i32, %arg1: i32, %arg2: memref<24x32xf32, #tpu.memory_space<vmem>>, %arg3: memref<24x1xi32, #tpu.memory_space<vmem>>, %arg4: memref<1x128xf32, #tpu.memory_space<vmem>>, %arg5: memref<24x1xf32, #tpu.memory_space<vmem>>, %arg6: memref<24x1xf32, #tpu.memory_space<vmem>>, %arg7: memref<24x1xf32, #tpu.memory_space<vmem>>) attributes {dimension_semantics = [#tpu.dimension_semantics<parallel>, #tpu.dimension_semantics<arbitrary>], iteration_bounds = array<i64: 2, 1>, scalar_prefetch = 0 : i64, scratch_operands = 3 : i64, tpu.core_type = #tpu.core_type<tc>, window_params = [{transform_indices = @transform_0, window_bounds = array<i64: 24, 32>}, {transform_indices = @transform_1, window_bounds = array<i64: 24, 1>}, {transform_indices = @transform_2, window_bounds = array<i64: 1, 128>}]} {
    %c0_i32 = arith.constant 0 : i32
    %0 = arith.cmpi eq, %arg1, %c0_i32 : i32
    %1 = arith.extui %0 : i1 to i32
    %c0_i32_0 = arith.constant 0 : i32
    %2 = arith.cmpi ne, %1, %c0_i32_0 : i32
    scf.if %2 {
      %cst_21 = arith.constant 0xFF800000 : f32
      %37 = vector.broadcast %cst_21 : f32 to vector<24x1xf32>
      %c0_22 = arith.constant 0 : index
      %c0_23 = arith.constant 0 : index
      %38 = vector.load %arg5[%c0_22, %c0_23] : memref<24x1xf32, #tpu.memory_space<vmem>>, vector<24x1xf32>
      tpu.vector_store %arg5[%c0_22, %c0_23], %37 {strides = array<i32>} : memref<24x1xf32, #tpu.memory_space<vmem>>, vector<24x1xf32>,
      %cst_24 = arith.constant 0.000000e+00 : f32
      %39 = vector.broadcast %cst_24 : f32 to vector<24x1xf32>
      %c0_25 = arith.constant 0 : index
      %c0_26 = arith.constant 0 : index
      %40 = vector.load %arg6[%c0_25, %c0_26] : memref<24x1xf32, #tpu.memory_space<vmem>>, vector<24x1xf32>
      tpu.vector_store %arg6[%c0_25, %c0_26], %39 {strides = array<i32>} : memref<24x1xf32, #tpu.memory_space<vmem>>, vector<24x1xf32>,
      %cst_27 = arith.constant 0.000000e+00 : f32
      %41 = vector.broadcast %cst_27 : f32 to vector<24x1xf32>
      %c0_28 = arith.constant 0 : index
      %c0_29 = arith.constant 0 : index
      %42 = vector.load %arg7[%c0_28, %c0_29] : memref<24x1xf32, #tpu.memory_space<vmem>>, vector<24x1xf32>
      tpu.vector_store %arg7[%c0_28, %c0_29], %41 {strides = array<i32>} : memref<24x1xf32, #tpu.memory_space<vmem>>, vector<24x1xf32>,
    } else {
    }
    %c0 = arith.constant 0 : index
    %c0_1 = arith.constant 0 : index
    %3 = vector.load %arg2[%c0, %c0_1] : memref<24x32xf32, #tpu.memory_space<vmem>>, vector<24x32xf32>
    %c0_2 = arith.constant 0 : index
    %c0_3 = arith.constant 0 : index
    %4 = vector.load %arg3[%c0_2, %c0_3] : memref<24x1xi32, #tpu.memory_space<vmem>>, vector<24x1xi32>
    %c32_i32 = arith.constant 32 : i32
    %5 = arith.muli %arg1, %c32_i32 : i32
    %6 = tpu.iota {dimensions = array<i32: 1>} : vector<24x32xi32>
    %7 = vector.broadcast %5 : i32 to vector<24x32xi32>
    %8 = arith.addi %7, %6 : vector<24x32xi32>
    %9 = vector.broadcast %4 : vector<24x1xi32> to vector<24x32xi32>
    %10 = arith.cmpi eq, %8, %9 : vector<24x32xi32>
    %cst = arith.constant 0.000000e+00 : f32
    %11 = vector.broadcast %cst : f32 to vector<24x32xf32>
    %12 = arith.select %10, %3, %11 : vector<24x32xi1>, vector<24x32xf32>
    %cst_4 = arith.constant dense<0.000000e+00> : vector<24xf32>
    %13 = vector.multi_reduction <add>, %12, %cst_4 [1] : vector<24x32xf32> to vector<24xf32>
    %14 = vector.shape_cast %13 : vector<24xf32> to vector<24x1xf32>
    %c0_5 = arith.constant 0 : index
    %c0_6 = arith.constant 0 : index
    %15 = vector.load %arg7[%c0_5, %c0_6] : memref<24x1xf32, #tpu.memory_space<vmem>>, vector<24x1xf32>
    %16 = arith.addf %15, %14 : vector<24x1xf32>
    %c0_7 = arith.constant 0 : index
    %c0_8 = arith.constant 0 : index
    %17 = vector.load %arg7[%c0_7, %c0_8] : memref<24x1xf32, #tpu.memory_space<vmem>>, vector<24x1xf32>
    tpu.vector_store %arg7[%c0_7, %c0_8], %16 {strides = array<i32>} : memref<24x1xf32, #tpu.memory_space<vmem>>, vector<24x1xf32>,
    %cst_9 = arith.constant dense<0xFF800000> : vector<24xf32>
    %18 = vector.multi_reduction <maximumf>, %3, %cst_9 [1] : vector<24x32xf32> to vector<24xf32>
    %19 = vector.shape_cast %18 : vector<24xf32> to vector<24x1xf32>
    %c0_10 = arith.constant 0 : index
    %c0_11 = arith.constant 0 : index
    %20 = vector.load %arg5[%c0_10, %c0_11] : memref<24x1xf32, #tpu.memory_space<vmem>>, vector<24x1xf32>
    %21 = arith.maximumf %20, %19 : vector<24x1xf32>
    %22 = vector.broadcast %21 : vector<24x1xf32> to vector<24x32xf32>
    %23 = arith.subf %3, %22 : vector<24x32xf32>
    %24 = math.exp %23 : vector<24x32xf32>
    %cst_12 = arith.constant dense<0.000000e+00> : vector<24xf32>
    %25 = vector.multi_reduction <add>, %24, %cst_12 [1] : vector<24x32xf32> to vector<24xf32>
    %26 = vector.shape_cast %25 : vector<24xf32> to vector<24x1xf32>
    %27 = arith.subf %20, %21 : vector<24x1xf32>
    %28 = math.exp %27 : vector<24x1xf32>
    %c0_13 = arith.constant 0 : index
    %c0_14 = arith.constant 0 : index
    %29 = vector.load %arg6[%c0_13, %c0_14] : memref<24x1xf32, #tpu.memory_space<vmem>>, vector<24x1xf32>
    %30 = arith.mulf %28, %29 : vector<24x1xf32>
    %31 = arith.addf %30, %26 : vector<24x1xf32>
    %c0_15 = arith.constant 0 : index
    %c0_16 = arith.constant 0 : index
    %32 = vector.load %arg6[%c0_15, %c0_16] : memref<24x1xf32, #tpu.memory_space<vmem>>, vector<24x1xf32>
    tpu.vector_store %arg6[%c0_15, %c0_16], %31 {strides = array<i32>} : memref<24x1xf32, #tpu.memory_space<vmem>>, vector<24x1xf32>,
    %c0_17 = arith.constant 0 : index
    %c0_18 = arith.constant 0 : index
    %33 = vector.load %arg5[%c0_17, %c0_18] : memref<24x1xf32, #tpu.memory_space<vmem>>, vector<24x1xf32>
    tpu.vector_store %arg5[%c0_17, %c0_18], %21 {strides = array<i32>} : memref<24x1xf32, #tpu.memory_space<vmem>>, vector<24x1xf32>,
    %c0_i32_19 = arith.constant 0 : i32
    %34 = arith.cmpi eq, %arg1, %c0_i32_19 : i32
    %35 = arith.extui %34 : i1 to i32
    %c0_i32_20 = arith.constant 0 : i32
    %36 = arith.cmpi ne, %35, %c0_i32_20 : i32
    scf.if %36 {
      %c0_21 = arith.constant 0 : index
      %c0_22 = arith.constant 0 : index
      %37 = vector.load %arg6[%c0_21, %c0_22] : memref<24x1xf32, #tpu.memory_space<vmem>>, vector<24x1xf32>
      %38 = math.log %37 : vector<24x1xf32>
      %c0_23 = arith.constant 0 : index
      %c0_24 = arith.constant 0 : index
      %39 = vector.load %arg5[%c0_23, %c0_24] : memref<24x1xf32, #tpu.memory_space<vmem>>, vector<24x1xf32>
      %40 = arith.addf %38, %39 : vector<24x1xf32>
      %c0_25 = arith.constant 0 : index
      %c0_26 = arith.constant 0 : index
      %41 = vector.load %arg7[%c0_25, %c0_26] : memref<24x1xf32, #tpu.memory_space<vmem>>, vector<24x1xf32>
      %42 = arith.subf %40, %41 : vector<24x1xf32>
      %c24_i32 = arith.constant 24 : i32
      %43 = arith.muli %arg0, %c24_i32 : i32
      %44 = tpu.iota {dimensions = array<i32: 0>} : vector<24x1xi32>
      %45 = vector.broadcast %43 : i32 to vector<24x1xi32>
      %46 = arith.addi %45, %44 : vector<24x1xi32>
      %c40_i32 = arith.constant 40 : i32
      %47 = vector.broadcast %c40_i32 : i32 to vector<24x1xi32>
      %48 = arith.cmpi slt, %46, %47 : vector<24x1xi32>
      %cst_27 = arith.constant 0.000000e+00 : f32
      %49 = vector.broadcast %cst_27 : f32 to vector<24x1xf32>
      %50 = arith.select %48, %42, %49 : vector<24x1xi1>, vector<24x1xf32>
      %51 = vector.shape_cast %50 : vector<24x1xf32> to vector<1x24x1xf32>
      %cst_28 = arith.constant dense<0.000000e+00> : vector<1xf32>
      %52 = vector.multi_reduction <add>, %51, %cst_28 [1, 2] : vector<1x24x1xf32> to vector<1xf32>
      %53 = vector.shape_cast %52 : vector<1xf32> to vector<1x1x1xf32>
      %54 = vector.extract %53[0, 0, 0] : f32 from vector<1x1x1xf32>
      %55 = tpu.iota {dimensions = array<i32: 1>} : vector<1x128xi32>
      %c0_i32_29 = arith.constant 0 : i32
      %56 = vector.broadcast %c0_i32_29 : i32 to vector<1x128xi32>
      %57 = arith.cmpi eq, %55, %56 : vector<1x128xi32>
      %cst_30 = arith.constant 0.000000e+00 : f32
      %58 = vector.broadcast %54 : f32 to vector<1x128xf32>
      %59 = vector.broadcast %cst_30 : f32 to vector<1x128xf32>
      %60 = arith.select %57, %58, %59 : vector<1x128xi1>, vector<1x128xf32>
      %c0_31 = arith.constant 0 : index
      %c0_32 = arith.constant 0 : index
      %61 = vector.load %arg4[%c0_31, %c0_32] : memref<1x128xf32, #tpu.memory_space<vmem>>, vector<1x128xf32>
      tpu.vector_store %arg4[%c0_31, %c0_32], %60 {strides = array<i32>} : memref<1x128xf32, #tpu.memory_space<vmem>>, vector<1x128xf32>,
    } else {
    }
    return
  }
  func.func @transform_0(%arg0: i32, %arg1: i32) -> (i32, i32) {
    %c0_i32 = arith.constant 0 : i32
    return %arg0, %arg1 : i32, i32
  }
  func.func @transform_1(%arg0: i32, %arg1: i32) -> (i32, i32) {
    %c0_i32 = arith.constant 0 : i32
    %c0_i32_0 = arith.constant 0 : i32
    return %arg0, %c0_i32 : i32, i32
  }
  func.func @transform_2(%arg0: i32, %arg1: i32) -> (i32, i32) {
    %c0_i32 = arith.constant 0 : i32
    %c0_i32_0 = arith.constant 0 : i32
    return %c0_i32, %arg0 : i32, i32
  }
}

</mosaic_0001>

<bundles_post_ra>
// kernel: tpu_custom_call.1
= control target key start
LH: loop header
LB: loop body
LE: loop exit
PB: predicated region body
PF: predicated region fallthrough
CT: control target
= control target key end

     0   :  { %7 = vsyncpa [#allocation6], 0  ;;  %s871_s0 = inlined_call_operand.vmem [shape: f32[40,32], index: 0, kind: input, shape index: {}]   ;;  %s872_s1 = inlined_call_operand.vmem [shape: s32[40,1], index: 1, kind: input, shape index: {}]   ;;  %s873_s2 = inlined_call_operand.hbm [shape: f32[1,256], index: 2, kind: output, shape index: {}]  }
   0x1   :  { %9 = vsyncpa [#allocation6 + $0x1], 0  ;;  %s695_s9 = smov 0   ;;  %s697_s10 = smov 0  }
   0x2   :  { %s699_s11 = smov 0   ;;  %s701_s12 = smov 0  }
   0x3   :  { %s703_s13 = smov 0   ;;  %s705_s14 = smov 0  }
   0x4 LB: > { %s508_s15 = sadd.s32 4294967295, %s674_s14   ;;  %s509_s16 = sadd.s32 4294967294, %s674_s14   ;;  %s674_s14 = sphi %s705_s14, %s15_s14   ;;  %s670_s13 = sphi %s703_s13, %s880_s13   ;;  %s666_s12 = sphi %s701_s12, %s879_s12   ;;  %s662_s11 = sphi %s699_s11, %s878_s11   ;;  %s658_s10 = sphi %s697_s10, %s877_s10   ;;  %s654_s9 = sphi %s695_s9, %s876_s9  }
   0x5   : > { %s27_s17 = sadd.s32 1, %s670_s13  ;;  %s88_s18 = sadd.s32 1, %s662_s11 }
   0x6   : > { %p29_p0 = scmp.ge.s32.totalorder %s27_s17, 2  ;;  %p98_p1 = scmp.ne.s32.totalorder %s662_s11, %s658_s10 }
   0x7   : > { %p99_p2 = scmp.eq.s32.totalorder %s508_s15, 1  ;;  %p104_p3 = scmp.ne.s32.totalorder %s658_s10, %s654_s9 }
   0x8   : > { %s882_s17 = smov (%p29_p0, %s27_s17), 0  ;;  %p105_p5 = scmp.eq.s32.totalorder %s509_s16, 1 }
   0x9   : > { %p735_p4 = por %p99_p2, %p98_p1  ;;  %s85_s20 = ssub.s32 %s670_s13, %s882_s17 }
   0xa   : > { %p512_p6 = scmp.ge.s32.totalorder %s674_s14, 1  ;;  %p86_p7 = scmp.eq.s32.totalorder %s85_s20, 0 }
   0xb   : > { %p742_p8 = por %p105_p5, %p104_p3  ;;  %p160_p9 = scmp.lt.s32.totalorder %s674_s14, 3 }
   0xc   : > { %s748_s22 = scalar_select %p86_p7, %s662_s11, %s88_s18  }
   0xd   : > { %p161_p10 = pnand %p512_p6, %p160_p9 }
   0xe   : > { %s197_s23 = smul.u32 (!%p161_p10), 3, %s666_s12  ;;  %s195_s4 = sand.u32 (!%p161_p10), 1, %s658_s10  }
   0xf   : > { %164 = sbr.rel (%p161_p10) target bundleno = 702 (0x2be), region = 28  ;;  %s515_s5 = sshll.u32 (!%p161_p10), %s666_s12, 4 }
  0x10   : > { %p202_p11 = scmp.lt.s32.totalorder (!%p161_p10), %s197_s23, 4  ;;  %s384_s3 = smul.u32 (!%p161_p10), 24, %s666_s12 }
  0x11   : > { %s196_s6 = scalar_lea.vmem (!%p161_p10), [#allocation5], %s195_s4  ;;  %s831_s18 = scalar_lea.hbm (!%p161_p10), %s873_s2, %s515_s5 }
  0x12   : > { %s430_s7 = sshll.u32 (!%p161_p10), %s196_s6, 4  ;;  %s418_s20 = scalar_lea.sflag (!%p161_p10), [#allocation6], %s195_s4  ;;  %s431_s7 = int_to_ptr.vmem [resolvable:$true] %s430_s7 }
  0x13   : > { %s679_s12 = smov (!%p161_p10), [#allocation5]  }
  0x14   : > { %vm232_vm0 = vcmask 7168   ;;  %v676_v0 = vmov -inf   ;;  %s884_s23 = smov (!%p202_p11, %s197_s23), 4  ;;  %vm268_vm1 = vcmask 261120   ;;  %v677_v7 = vmov 0  }
  0x15   : > { %233 = vst.msk [vmem:[#allocation2] sm:$0xff] %vm232_vm0, %v676_v0  ;;  %234 = vst.msk [vmem:[#allocation2 + $0x8] sm:$0xff] %vm232_vm0, %v676_v0  ;;  %s513_s24 = sshll.u32 %s884_s23, 3  ;;  %578 = vset.pattern.permute.xlu1 %v677_v7  ;;  %579 = vset.pattern.permute.xlu0 %v677_v7  ;;  %v678_v8 = vmov 0.0   ;;  %v249_v34 = vlaneseq  ;;  %s598_s23 = scalar_lea.vmem %s431_s7, 16 }
  0x16   : > { %235 = vst.msk [vmem:[#allocation2 + $0x10] sm:$0xff] %vm232_vm0, %v676_v0  ;;  %s208_s27 = scalar_lea.vmem %s871_s0, %s513_s24  ;;  %236 = vst.msk [vmem:[#allocation3] sm:$0xff] %vm232_vm0, %v678_v8  ;;  %s222_s30 = scalar_lea.vmem %s872_s1, %s513_s24 }
  0x17   : > { %v762_v1 = vld [vmem:[%s208_s27] sm:$0xff]  ;;  %v764_v2 = vld [vmem:[%s208_s27 + $0x10] sm:$0xff]  ;;  %v766_v3 = vld [vmem:[%s208_s27 + $0x8] sm:$0xff]  ;;  %237 = vst.msk [vmem:[#allocation3 + $0x8] sm:$0xff] %vm232_vm0, %v678_v8  ;;  %v800_v36 = vand.u32 127, %v249_v34  ;;  %p599_p12 = scmp.ne.s32.totalorder %s431_s7, %s598_s23  ;;  %s602_s24 = sshll.u32 %s679_s12, 4  ;;  %s603_s24 = int_to_ptr.vmem [resolvable:$false] %s602_s24 }
  0x18   : > { %v288_v4 = vsel %vm268_vm1, %v762_v1, -inf  ;;  %v294_v5 = vsel %vm268_vm1, %v764_v2, -inf  ;;  %v291_v6 = vsel %vm268_vm1, %v766_v3, -inf  ;;  %238 = vst.msk [vmem:[#allocation3 + $0x10] sm:$0xff] %vm232_vm0, %v678_v8  ;;  %239 = vst.msk [vmem:[#allocation4] sm:$0xff] %vm232_vm0, %v678_v8  ;;  %v245_v21 = vld [vmem:[%s222_s30] sm:$0xff]  ;;  %p605_p1 = scmp.lt.s32.totalorder %s431_s7, %s603_s24 }
  0x19   : > { %289 = vmax.xlane.f32.xlu0 %v288_v4  ;;  %295 = vmax.xlane.f32.xlu1 %v294_v5  ;;  %240 = vst.msk [vmem:[#allocation4 + $0x8] sm:$0xff] %vm232_vm0, %v678_v8  ;;  %241 = vst.msk [vmem:[#allocation4 + $0x10] sm:$0xff] %vm232_vm0, %v678_v8  ;;  %v246_v22 = vld [vmem:[%s222_s30 + $0x8] sm:$0xff]  ;;  %v247_v23 = vld [vmem:[%s222_s30 + $0x10] sm:$0xff]  ;;  %vm413_vm8 = vcmp.eq.s32.totalorder %v800_v36, 0  ;;  %p600_p13 = pnand %p599_p12, %p735_p4  ;;  %s604_s25 = scalar_lea.vmem %s603_s24, 32 }
  0x1a   : > { %p606_p2 = scmp.lt.s32.totalorder %s604_s25, %s598_s23 }
  0x1b   : > { %p601_p0 = pneg %p600_p13 }
  0x1c   : > { %v780_v9 = vld [vmem:[#allocation2] sm:$0xff]  ;;  %v298_v15 = vld [vmem:[#allocation2 + $0x8] sm:$0xff]  ;;  %p607_p3 = por %p606_p2, %p605_p1 }
  0x1d   : > { %292 = vmax.xlane.f32.xlu0 %v291_v6  ;;  %v782_v10 = vld [vmem:[#allocation2 + $0x10] sm:$0xff]  ;;  %v345_v54 = vld [vmem:[#allocation3] sm:$0xff] }
  0x1e   : > { %v346_v61 = vld [vmem:[#allocation3 + $0x8] sm:$0xff]  ;;  %p608_p5 = pnand %p607_p3, %p601_p0 }
  0x1f   : > { %v347_v58 = vld [vmem:[#allocation3 + $0x10] sm:$0xff]  ;;  %v278_v4 = vld [vmem:[#allocation4] sm:$0xff] }
  0x20   : > { %v280_v5 = vld [vmem:[#allocation4 + $0x10] sm:$0xff] }
  0xa2   : > { %v290_v11 = vpop.xlane.xlu0 %289  ;;  %v296_v12 = vpop.xlane.xlu1 %295 }
  0xa3   : > { %v300_v13 = vmax.f32 %v780_v9, %v290_v11  ;;  %v302_v14 = vmax.f32 %v782_v10, %v296_v12 }
  0xa5   : > { %v336_v16 = vsub.f32 %v780_v9, %v300_v13  ;;  %357 = vst.msk [vmem:[#allocation2] sm:$0xff] %vm232_vm0, %v300_v13  ;;  %305 = vperm.xlu1 %578, %v300_v13   ;;  %v338_v17 = vsub.f32 %v782_v10, %v302_v14  ;;  %359 = vst.msk [vmem:[#allocation2 + $0x10] sm:$0xff] %vm232_vm0, %v302_v14  ;;  %v279_v10 = vld [vmem:[#allocation4 + $0x8] sm:$0xff] }
  0xa6   : > { %v293_v18 = vpop.xlane.xlu0 %292 }
  0xa7   : > { %v301_v19 = vmax.f32 %v298_v15, %v293_v18  ;;  %v339_v50 = vmul.f32 1.442695, %v336_v16  ;;  %v343_v51 = vmul.f32 1.442695, %v338_v17  ;;  %v386_v16 = vshrl.u32 %v249_v34, 7 }
  0xa8   : > { %v389_v18 = vstv %s384_s3 }
  0xa9   : > { %v337_v20 = vsub.f32 %v298_v15, %v301_v19  ;;  %358 = vst.msk [vmem:[#allocation2 + $0x8] sm:$0xff] %vm232_vm0, %v301_v19  ;;  %315 = vperm.xlu1 %578, %v302_v14   ;;  %310 = vperm.xlu0 %579, %v301_v19  }
  0xab   : > { %v341_v52 = vmul.f32 1.442695, %v337_v20  ;;  %v387_v20 = vadd.s32 8, %v386_v16 }
  0xad   : > { %254 = vperm.xlu1 %578, %v245_v21   ;;  %v388_v21 = vadd.s32 16, %v386_v16 }
  0xb1   : > { %257 = vperm.xlu1 %578, %v246_v22   ;;  %v372_v22 = vld [vmem:[#allocation2] sm:$0xff] }
  0xb5   : > { %260 = vperm.xlu1 %578, %v247_v23  }
 0x120   : > { %v306_v24 = vpop.permute.xlu1 %305 }
 0x121   : > { %v318_v25 = vsub.f32 %v762_v1, %v306_v24  ;;  %v390_v24 = vadd.s32 %v389_v18, %v386_v16 }
 0x123   : > { %v321_v26 = vmul.f32 1.442695, %v318_v25  ;;  %vm393_vm5 = vcmp.lt.s32.totalorder %v390_v24, 40 }
 0x124   : > { %v316_v27 = vpop.permute.xlu1 %315  ;;  %v311_v28 = vpop.permute.xlu0 %310 }
 0x125   : > { %580 = vpow2.f32 %v321_v26  ;;  %v320_v29 = vsub.f32 %v764_v2, %v316_v27  ;;  %v319_v30 = vsub.f32 %v766_v3, %v311_v28 }
 0x127   : > { %v325_v31 = vmul.f32 1.442695, %v320_v29  ;;  %v323_v32 = vmul.f32 1.442695, %v319_v30  ;;  %v391_v29 = vadd.s32 %v389_v18, %v387_v20  ;;  %v392_v30 = vadd.s32 %v389_v18, %v388_v21 }
 0x128   : > { %v255_v33 = vpop.permute.xlu1 %254 }
 0x129   : > { %582 = vpow2.f32 %v325_v31  ;;  %vm262_vm2 = vcmp.eq.s32.totalorder %v800_v36, %v255_v33  ;;  %vm394_vm6 = vcmp.lt.s32.totalorder %v391_v29, 40  ;;  %vm395_vm7 = vcmp.lt.s32.totalorder %v392_v30, 40 }
 0x12a   : > { %584 = vpow2.f32 %v323_v32  ;;  %v265_v44 = vsel %vm262_vm2, %v762_v1, 0.0  ;;  %v374_v32 = vld [vmem:[#allocation2 + $0x10] sm:$0xff] }
 0x12b   : > { %v269_v46 = vsel %vm268_vm1, %v265_v44, 0.0  ;;  %586 = vpow2.f32 %v339_v50 }
 0x12c   : > { %v258_v35 = vpop.permute.xlu1 %257  ;;  %588 = vpow2.f32 %v343_v51 }
 0x12d   : > { %vm263_vm4 = vcmp.eq.s32.totalorder %v800_v36, %v258_v35  ;;  %590 = vpow2.f32 %v341_v52  ;;  %v373_v35 = vld [vmem:[#allocation2 + $0x8] sm:$0xff] }
 0x12e   : > { %v266_v48 = vsel %vm263_vm4, %v766_v3, 0.0 }
 0x12f   : > { %v272_v49 = vsel %vm268_vm1, %v266_v48, 0.0 }
 0x130   : > { %v261_v38 = vpop.permute.xlu1 %260 }
 0x131   : > { %vm264_vm3 = vcmp.eq.s32.totalorder %v800_v36, %v261_v38 }
 0x132   : > { %v581_v37 = vpop.eup %580  ;;  %v267_v45 = vsel %vm264_vm3, %v764_v2, 0.0 }
 0x133   : > { %v327_v39 = vsel %vm268_vm1, %v581_v37, 0.0  ;;  %v275_v47 = vsel %vm268_vm1, %v267_v45, 0.0 }
 0x134   : > { %328 = vadd.xlane.f32.xlu1 %v327_v39 }
 0x136   : > { %v583_v40 = vpop.eup %582 }
 0x137   : > { %v585_v41 = vpop.eup %584  ;;  %v333_v42 = vsel %vm268_vm1, %v583_v40, 0.0 }
 0x138   : > { %334 = vadd.xlane.f32.xlu1 %v333_v42  ;;  %v330_v43 = vsel %vm268_vm1, %v585_v41, 0.0  ;;  %v587_v53 = vpop.eup %586 }
 0x139   : > { %331 = vadd.xlane.f32.xlu0 %v330_v43  ;;  %v348_v55 = vmul.f32 %v587_v53, %v345_v54  ;;  %v589_v56 = vpop.eup %588 }
 0x13a   : > { %v591_v59 = vpop.eup %590  ;;  %v350_v62 = vmul.f32 %v589_v56, %v347_v58 }
 0x13b   : > { %v349_v0 = vmul.f32 %v591_v59, %v346_v61 }
 0x13c   : > { %270 = vadd.xlane.f32.xlu1 %v269_v46 }
 0x13d   : > { %276 = vadd.xlane.f32.xlu0 %v275_v47 }
 0x140   : > { %273 = vadd.xlane.f32.xlu1 %v272_v49 }
 0x1bd   : > { %v329_v57 = vpop.xlane.xlu1 %328 }
 0x1be   : > { %v351_v60 = vadd.f32 %v348_v55, %v329_v57 }
 0x1c0   : > { %354 = vst.msk [vmem:[#allocation3] sm:$0xff] %vm232_vm0, %v351_v60 }
 0x1c1   : > { %v335_v63 = vpop.xlane.xlu1 %334 }
 0x1c2   : > { %v353_v1 = vadd.f32 %v350_v62, %v335_v63  ;;  %v332_v2 = vpop.xlane.xlu0 %331 }
 0x1c3   : > { %v352_v3 = vadd.f32 %v349_v0, %v332_v2 }
 0x1c4   : > { %356 = vst.msk [vmem:[#allocation3 + $0x10] sm:$0xff] %vm232_vm0, %v353_v1 }
 0x1c5   : > { %355 = vst.msk [vmem:[#allocation3 + $0x8] sm:$0xff] %vm232_vm0, %v352_v3  ;;  %v271_v6 = vpop.xlane.xlu1 %270 }
 0x1c6   : > { %v281_v7 = vadd.f32 %v278_v4, %v271_v6  ;;  %v277_v8 = vpop.xlane.xlu0 %276 }
 0x1c7   : > { %v283_v9 = vadd.f32 %v280_v5, %v277_v8  ;;  %v363_v11 = vld [vmem:[#allocation3] sm:$0xff] }
 0x1c8   : > { %285 = vst.msk [vmem:[#allocation4] sm:$0xff] %vm232_vm0, %v281_v7  ;;  %592 = vlog2.f32 %v363_v11 }
 0x1c9   : > { %287 = vst.msk [vmem:[#allocation4 + $0x10] sm:$0xff] %vm232_vm0, %v283_v9  ;;  %v274_v12 = vpop.xlane.xlu1 %273 }
 0x1ca   : > { %v282_v13 = vadd.f32 %v279_v10, %v274_v12 }
 0x1cb   : > { %v365_v14 = vld [vmem:[#allocation3 + $0x10] sm:$0xff] }
 0x1cc   : > { %286 = vst.msk [vmem:[#allocation4 + $0x8] sm:$0xff] %vm232_vm0, %v282_v13  ;;  %v364_v15 = vld [vmem:[#allocation3 + $0x8] sm:$0xff]  ;;  %594 = vlog2.f32 %v365_v14 }
 0x1cd   : > { %596 = vlog2.f32 %v364_v15 }
 0x1cf   : > { %v378_v28 = vld [vmem:[#allocation4] sm:$0xff] }
 0x1d0   : > { %v380_v38 = vld [vmem:[#allocation4 + $0x10] sm:$0xff] }
 0x1d3   : > { %v379_v39 = vld [vmem:[#allocation4 + $0x8] sm:$0xff] }
 0x1d5   : > { %v593_v17 = vpop.eup %592 }
 0x1d6   : > { %v367_v19 = vmul.f32 0.6931472, %v593_v17 }
 0x1d8   : > { %v375_v23 = vadd.f32 %v372_v22, %v367_v19 }
 0x1d9   : > { %v595_v25 = vpop.eup %594 }
 0x1da   : > { %v597_v26 = vpop.eup %596  ;;  %v371_v27 = vmul.f32 0.6931472, %v595_v25  ;;  %v381_v33 = vsub.f32 %v375_v23, %v378_v28 }
 0x1db   : > { %v369_v31 = vmul.f32 0.6931472, %v597_v26 }
 0x1dc   : > { %v377_v37 = vadd.f32 %v374_v32, %v371_v27  ;;  %v396_v42 = vsel %vm393_vm5, %v381_v33, 0.0 }
 0x1dd   : > { %v376_v34 = vadd.f32 %v373_v35, %v369_v31  ;;  %v399_v45 = vsel %vm232_vm0, %v396_v42, 0.0 }
 0x1de   : > { %v383_v40 = vsub.f32 %v377_v37, %v380_v38 }
 0x1df   : > { %v382_v41 = vsub.f32 %v376_v34, %v379_v39 }
 0x1e0   : > { %v398_v44 = vsel %vm395_vm7, %v383_v40, 0.0 }
 0x1e1   : > { %v397_v43 = vsel %vm394_vm6, %v382_v41, 0.0  ;;  %v402_v48 = vsel %vm232_vm0, %v398_v44, 0.0 }
 0x1e2   : > { %v400_v46 = vsel %vm232_vm0, %v397_v43, 0.0 }
 0x1e3   : > { %v401_v47 = vadd.f32 %v400_v46, %v399_v45 }
 0x1e5   : > { %v403_v49 = vadd.f32 %v402_v48, %v401_v47 }
 0x1e7   : > { %404 = vadd.xlane.f32.xlu1 %v403_v49 }
 0x270   : > { %v405_v50 = vpop.xlane.xlu1 %404 }
 0x271   : > { %v406_v51 = vrot.slane %v405_v50, 4 }
 0x273   : > { %v407_v52 = vadd.f32 %v406_v51, %v405_v50 }
 0x275   : > { %v408_v53 = vrot.slane %v407_v52, 2 }
 0x277   : > { %v409_v54 = vadd.f32 %v408_v53, %v407_v52 }
 0x279   : > { %v410_v55 = vrot.slane %v409_v54, 1 }
 0x27b   : > { %v411_v56 = vadd.f32 %v410_v55, %v409_v54 }
 0x27d   : > { %518 = vpush %v411_v56 }
 0x2ae   : > { %s519_s8 = spop %518 }
 0x2af   : > { %v414_v57 = vstv %s519_s8 }
 0x2b0   : > { %v415_v58 = vsel %vm413_vm8, %v414_v57, 0.0 }
 0x2b1   : > { %416 = vst [vmem:[%s196_s6] sm:$0x1] %v415_v58 }
 0x2b2   : > { %611 = shalt.err (!%p608_p5)
}
 0x2b3   : > { %s612_s26 = scalar_lea.hbm %s831_s18, 16  ;;  %s616_s29 = scalar_lea.hbm %s873_s2, 32 }
 0x2b4   : > { %p613_p6 = scmp.ne.s32.totalorder %s831_s18, %s612_s26  ;;  %p617_p10 = scmp.lt.s32.totalorder %s831_s18, %s873_s2 }
 0x2b5   : > { %p618_p11 = scmp.lt.s32.totalorder %s616_s29, %s612_s26 }
 0x2b6   : > { %p614_p7 = pnand %p613_p6, %p735_p4 }
 0x2b7   : > { %p619_p12 = por %p618_p11, %p617_p10 }
 0x2b8   : > { %p615_p9 = pneg %p614_p7 }
 0x2ba   : > { %p620_p13 = pnand %p619_p12, %p615_p9 }
 0x2bc   : > { %623 = shalt.err (!%p620_p13)
}
 0x2bd   : > { %520 = dma.vmem_to_hbm [thread:$0]  (%p735_p4), %s431_s7, 16, %s831_s18, %s418_s20  }
 0x2be PF: > { %p526_p0 = scmp.ge.s32.totalorder %s674_s14, 2  ;;  %s442_s4 = sand.u32 1, %s654_s9  }
 0x2bf   : > { %s443_s5 = scalar_lea.sflag [#allocation6], %s442_s4 }
 0x2c0   : > { %p523_p1 = pnand %p526_p0, %p742_p8 }
 0x2c2   : > { %p524_p2 = pneg %p523_p1 }
 0x2c4   : > { %649 = dma.done.wait (%p524_p2), %s443_s5, 16  }
 0x2c5   : > { %651 = vsyncadd (%p524_p2), %s443_s5, 4294967280  ;;  %s15_s14 = sadd.s32 1, %s674_s14   ;;  %s876_s9 = smov %s658_s10 }
 0x2c6   : > { %p12_p3 = scmp.ge.s32.totalorder %s15_s14, 4   ;;  %s877_s10 = smov %s662_s11 }
 0x2c7   : > { %s878_s11 = smov %s748_s22  ;;  %s879_s12 = smov %s670_s13 }
 0x2c8   : > { %s880_s13 = smov %s882_s17  ;;  %14 = sbr.rel (!%p12_p3) target bundleno = 4 (0x4), region = 74 }
 0x2cd   :  { %447 = vsyncpa [#allocation6], 1 }
 0x2ce   :  { %449 = vsyncpa [#allocation6 + $0x1], 1 }

</bundles_post_ra>
